<compile_context>
chip_gen: v7x
topology: tpu7x:2x2x1
jax: 0.10.0
libtpu: 0.0.40
codegen_flags: <defaults>
</compile_context>

<pallas_src>
import jax
import jax.numpy as jnp
from jax import lax
from jax.experimental import pallas as pl
from jax.experimental.pallas import tpu as pltpu


def sgns_kernel(c_ref, o_ref, n_ref, v_tab_ref, u_tab_ref, pos_ref, neg_ref):
    # Per grid step (one batch block):
    #   c_ref     : (T, 1)       int32  column layout (rows -> sublanes)
    #   o_ref     : (1, 1, T)    int32  lane-dense
    #   n_ref     : (1, 1, J*T)  int32  lane-dense, j-major
    #   v_tab_ref : (V, D)       bf16   VMEM-resident vEmbedding
    #   u_tab_ref : (V, D)       bf16   VMEM-resident uEmbedding
    #   pos_ref   : (1, 1, T)    f32
    #   neg_ref   : (1, 1, J*T)  f32
    T = c_ref.shape[0]
    JT = n_ref.shape[2]
    J = JT // T
    V, D = v_tab_ref.shape

    # ---- fused gather: vv[t] = vEmbedding[c[t]] via one-hot matmul (MXU) ----
    # One-hot values are exact in bf16; f32 accumulation => exact gather of the
    # bf16 table rows.  (Out-of-range indices silently gather a zero row.)
    c_col = c_ref[...]                                               # (T, 1)
    iota_tv = lax.broadcasted_iota(jnp.int32, (T, V), 1)             # (T, V)
    onehot_c = jnp.where(iota_tv == c_col, 1.0, 0.0).astype(jnp.bfloat16)
    vv = lax.dot_general(onehot_c, v_tab_ref[...],
                         (((1,), (0,)), ((), ())),
                         preferred_element_type=jnp.float32)         # (T, D) f32

    # ---- scores[w, t] = uEmbedding[w] . vv[t]  -- one MXU matmul ------------
    # Transposed-rhs contraction (flash-attention pattern); vv holds exact bf16
    # values so casting it back to bf16 is lossless.
    scores = lax.dot_general(u_tab_ref[...], vv.astype(jnp.bfloat16),
                             (((1,), (1,)), ((), ())),
                             preferred_element_type=jnp.float32)     # (V, T) f32

    # ---- select the 1 positive + J negative logits --------------------------
    # Unrolled (1+J)-slot loop: live set per iteration is one (V, T) mask --
    # no (T, J, V) temporaries and no duplicated compare/reduce chains.
    iota_vt = lax.broadcasted_iota(jnp.int32, (V, T), 0)             # (V, T)

    def select_logit(idx_row):                                       # idx_row (1, T)
        sel = iota_vt == idx_row                                     # (V, T) bool
        return jnp.sum(jnp.where(sel, scores, 0.0),
                       axis=0, keepdims=True)                        # (1, T)

    rows = [select_logit(o_ref[0, :, :])]                            # pos: sigmoid(+s)
    for j in range(J):                                               # neg: sigmoid(-s)
        rows.append(-select_logit(n_ref[0, :, j * T:(j + 1) * T]))
    z = jnp.concatenate(rows, axis=0)                                # (1+J, T)

    # ---- fused sigmoid on the EUP: exp + approximate reciprocal -------------
    probs = pl.reciprocal(1.0 + jnp.exp(-z), approx=True)            # (1+J, T)

    pos_ref[0, :, :] = probs[0:1, :]
    for j in range(J):
        neg_ref[0, :, j * T:(j + 1) * T] = probs[j + 1:j + 2, :]


def _pick_tb(B, K, target=256):
    """Largest batch tile whose flattened row tb*K is MXU/lane friendly."""
    best = None
    for tb in range(B, 0, -1):
        if B % tb:
            continue
        t = tb * K
        if t <= target and t % 128 == 0:
            return tb                       # lane-dense rows: best case
        if best is None and t <= target and t % 8 == 0:
            best = tb
    return best if best is not None else B


def sgns_forward(v_emb, u_emb, c, o, neg, *, tb=None):
    """SGNS forward pass.

    v_emb, u_emb : (vocab, D) float32 embedding tables (stored bf16 in-kernel)
    c, o         : (B, K) int indices
    neg          : (B, J, K) int indices
    returns (pos (B, K), neg (B, J, K)) float32
    """
    V, D = v_emb.shape
    B, K = c.shape
    J = neg.shape[1]

    if tb is None:
        tb = _pick_tb(B, K)
    if B % tb != 0 or (tb * K) % 8 != 0:
        tb = B                               # single full-array block: always valid
    Bt = B // tb
    T = tb * K

    # bf16 tables: exact one-hot gathers, half the resident VMEM / MXU passes.
    v_tab = v_emb.astype(jnp.bfloat16)
    u_tab = u_emb.astype(jnp.bfloat16)

    # Lane-dense layouts.  c goes in as a (B*K, 1) column so the one-hot gather
    # needs no in-kernel lane->sublane relayout; o / neg flattened per block.
    c_col = c.astype(jnp.int32).reshape(B * K, 1)
    o_row = o.astype(jnp.int32).reshape(Bt, 1, T)
    n_row = (neg.astype(jnp.int32)
             .reshape(Bt, tb, J, K).transpose(0, 2, 1, 3).reshape(Bt, 1, J * T))

    # Advisory cost hint + VMEM budget derived from actual block sizes.
    flops = Bt * (4 * T * V * D + 3 * (1 + J) * V * T)
    bytes_accessed = (4 * (c_col.size + o_row.size + n_row.size
                           + B * K + B * J * K)
                      + 2 * (v_tab.size + u_tab.size))
    cost = pl.CostEstimate(flops=flops,
                           transcendentals=B * K * (1 + J),
                           bytes_accessed=bytes_accessed)

    table_bytes = 2 * (V * D * 2)                      # two bf16 resident tables
    block_bytes = 4 * (T + T + J * T + T + J * T)      # idx + output blocks
    vmem_limit = int(2 * (table_bytes + block_bytes) + (8 << 20))

    pos_flat, neg_flat = pl.pallas_call(
        sgns_kernel,
        out_shape=(
            jax.ShapeDtypeStruct((Bt, 1, T), jnp.float32),
            jax.ShapeDtypeStruct((Bt, 1, J * T), jnp.float32),
        ),
        grid=(Bt,),
        in_specs=[
            pl.BlockSpec((T, 1), lambda i: (i, 0)),            # c column
            pl.BlockSpec((1, 1, T), lambda i: (i, 0, 0)),      # o (lane-dense)
            pl.BlockSpec((1, 1, J * T), lambda i: (i, 0, 0)),  # neg (lane-dense)
            pl.BlockSpec((V, D), lambda i: (0, 0)),            # vEmbedding (resident)
            pl.BlockSpec((V, D), lambda i: (0, 0)),            # uEmbedding (resident)
        ],
        out_specs=(
            pl.BlockSpec((1, 1, T), lambda i: (i, 0, 0)),
            pl.BlockSpec((1, 1, J * T), lambda i: (i, 0, 0)),
        ),
        compiler_params=pltpu.CompilerParams(
            dimension_semantics=("parallel",),
            vmem_limit_bytes=vmem_limit,
        ),
        cost_estimate=cost,
    )(c_col, o_row, n_row, v_tab, u_tab)

    pos = pos_flat.reshape(B, K)
    neg_out = (neg_flat.reshape(Bt, J, tb, K)
               .transpose(0, 2, 1, 3).reshape(B, J, K))
    return pos, neg_out


if __name__ == "__main__":
    key = jax.random.PRNGKey(0)
    vocab_size, emb_dim = 128, 32         # SGNS(vocab_size, emb_dim)
    B, K, J = 16, 8, 5                    # batch, context positions, negatives

    k1, k2, k3, k4, k5 = jax.random.split(key, 5)
    # nn.Embedding default init: N(0, 1)
    v_emb = jax.random.normal(k1, (vocab_size, emb_dim), dtype=jnp.float32)
    u_emb = jax.random.normal(k2, (vocab_size, emb_dim), dtype=jnp.float32)

    c = jax.random.randint(k3, (B, K), 0, vocab_size, dtype=jnp.int32)
    o = jax.random.randint(k4, (B, K), 0, vocab_size, dtype=jnp.int32)
    neg = jax.random.randint(k5, (B, J, K), 0, vocab_size, dtype=jnp.int32)

    fwd = jax.jit(sgns_forward, static_argnames=("tb",))
    pos, neg_out = fwd(v_emb, u_emb, c, o, neg)
    jax.block_until_ready((pos, neg_out))

    # Pure-JAX reference (mirrors the PyTorch einsums).  The kernel stores the
    # embedding tables in bf16 (perf-review change), so the reference uses the
    # identically quantized tables; the remaining tolerance covers
    # pl.reciprocal(approx=True) (~2^-12 rel error) and summation order.
    v_q = v_emb.astype(jnp.bfloat16).astype(jnp.float32)
    u_q = u_emb.astype(jnp.bfloat16).astype(jnp.float32)
    vv = v_q[c]
    uu = u_q[o]
    ng = u_q[neg]
    pos_ref = jax.nn.sigmoid(jnp.einsum("bkd,bkd->bk", uu, vv))
    neg_ref = jax.nn.sigmoid(-jnp.einsum("bjkd,bkd->bjk", ng, vv))

    assert pos.shape == (B, K) and neg_out.shape == (B, J, K)
    assert jnp.allclose(pos, pos_ref, atol=2e-3, rtol=2e-3)
    assert jnp.allclose(neg_out, neg_ref, atol=2e-3, rtol=2e-3)

    print("KERNEL_OK")
</pallas_src>

<mosaic_0001>
module attributes {stable_mosaic.version = 11 : i64} {
  func.func @sgns_kernel(%arg0: i32, %arg1: memref<128x1xi32, #tpu.memory_space<vmem>>, %arg2: memref<1x1x128xi32, #tpu.memory_space<vmem>>, %arg3: memref<1x1x640xi32, #tpu.memory_space<vmem>>, %arg4: memref<128x32xbf16, #tpu.memory_space<vmem>>, %arg5: memref<128x32xbf16, #tpu.memory_space<vmem>>, %arg6: memref<1x1x128xf32, #tpu.memory_space<vmem>>, %arg7: memref<1x1x640xf32, #tpu.memory_space<vmem>>) attributes {dimension_semantics = [#tpu.dimension_semantics<parallel>], iteration_bounds = array<i64: 1>, scalar_prefetch = 0 : i64, scratch_operands = 0 : i64, tpu.core_type = #tpu.core_type<tc>, window_params = [{transform_indices = @transform_0, window_bounds = array<i64: 128, 1>}, {transform_indices = @transform_1, window_bounds = array<i64: 1, 1, 128>}, {transform_indices = @transform_2, window_bounds = array<i64: 1, 1, 640>}, {pipeline_mode = #tpu.pipeline_mode<synchronous>, transform_indices = @transform_3, window_bounds = array<i64: 128, 32>}, {pipeline_mode = #tpu.pipeline_mode<synchronous>, transform_indices = @transform_4, window_bounds = array<i64: 128, 32>}, {transform_indices = @transform_5, window_bounds = array<i64: 1, 1, 128>}, {transform_indices = @transform_6, window_bounds = array<i64: 1, 1, 640>}]} {
    %c0 = arith.constant 0 : index
    %c0_0 = arith.constant 0 : index
    %0 = vector.load %arg1[%c0, %c0_0] : memref<128x1xi32, #tpu.memory_space<vmem>>, vector<128x1xi32>
    %1 = tpu.iota {dimensions = array<i32: 1>} : vector<128x128xi32>
    %2 = vector.broadcast %0 : vector<128x1xi32> to vector<128x128xi32>
    %3 = arith.cmpi eq, %1, %2 : vector<128x128xi32>
    %cst = arith.constant 1.000000e+00 : f32
    %cst_1 = arith.constant 0.000000e+00 : f32
    %4 = vector.broadcast %cst : f32 to vector<128x128xf32>
    %5 = vector.broadcast %cst_1 : f32 to vector<128x128xf32>
    %6 = arith.select %3, %4, %5 : vector<128x128xi1>, vector<128x128xf32>
    %7 = arith.truncf %6 : vector<128x128xf32> to vector<128x128xbf16>
    %c0_2 = arith.constant 0 : index
    %c0_3 = arith.constant 0 : index
    %8 = vector.load %arg4[%c0_2, %c0_3] : memref<128x32xbf16, #tpu.memory_space<vmem>>, vector<128x32xbf16>
    %cst_4 = arith.constant dense<0.000000e+00> : vector<128x32xf32>
    %9 = tpu.matmul %7, %8, %cst_4 {dimension_numbers = #tpu.dot_dimension_numbers<[1], [0], [0], [1], [0, 0, 1, 1], [], []>} : vector<128x128xbf16>, vector<128x32xbf16>, vector<128x32xf32> -> vector<128x32xf32>
    %c0_5 = arith.constant 0 : index
    %c0_6 = arith.constant 0 : index
    %10 = vector.load %arg5[%c0_5, %c0_6] : memref<128x32xbf16, #tpu.memory_space<vmem>>, vector<128x32xbf16>
    %11 = arith.truncf %9 : vector<128x32xf32> to vector<128x32xbf16>
    %cst_7 = arith.constant dense<0.000000e+00> : vector<128x128xf32>
    %12 = tpu.matmul %10, %11, %cst_7 {dimension_numbers = #tpu.dot_dimension_numbers<[1], [1], [0], [0], [0, 0, 1, 0], [], []>} : vector<128x32xbf16>, vector<128x32xbf16>, vector<128x128xf32> -> vector<128x128xf32>
    %13 = tpu.iota {dimensions = array<i32: 0>} : vector<128x128xi32>
    %c0_8 = arith.constant 0 : index
    %c0_9 = arith.constant 0 : index
    %c0_10 = arith.constant 0 : index
    %14 = vector.load %arg2[%c0_8, %c0_9, %c0_10] : memref<1x1x128xi32, #tpu.memory_space<vmem>>, vector<1x1x128xi32>
    %15 = vector.shape_cast %14 : vector<1x1x128xi32> to vector<1x128xi32>
    %16 = vector.broadcast %15 : vector<1x128xi32> to vector<128x128xi32>
    %17 = arith.cmpi eq, %13, %16 : vector<128x128xi32>
    %cst_11 = arith.constant 0.000000e+00 : f32
    %18 = vector.broadcast %cst_11 : f32 to vector<128x128xf32>
    %19 = arith.select %17, %12, %18 : vector<128x128xi1>, vector<128x128xf32>
    %cst_12 = arith.constant dense<0.000000e+00> : vector<128xf32>
    %20 = vector.multi_reduction <add>, %19, %cst_12 [0] : vector<128x128xf32> to vector<128xf32>
    %21 = vector.shape_cast %20 : vector<128xf32> to vector<1x128xf32>
    %c0_13 = arith.constant 0 : index
    %c0_14 = arith.constant 0 : index
    %c0_15 = arith.constant 0 : index
    %22 = vector.load %arg3[%c0_13, %c0_14, %c0_15] : memref<1x1x640xi32, #tpu.memory_space<vmem>>, vector<1x1x128xi32>
    %23 = vector.shape_cast %22 : vector<1x1x128xi32> to vector<1x128xi32>
    %24 = vector.broadcast %23 : vector<1x128xi32> to vector<128x128xi32>
    %25 = arith.cmpi eq, %13, %24 : vector<128x128xi32>
    %cst_16 = arith.constant 0.000000e+00 : f32
    %26 = vector.broadcast %cst_16 : f32 to vector<128x128xf32>
    %27 = arith.select %25, %12, %26 : vector<128x128xi1>, vector<128x128xf32>
    %cst_17 = arith.constant dense<0.000000e+00> : vector<128xf32>
    %28 = vector.multi_reduction <add>, %27, %cst_17 [0] : vector<128x128xf32> to vector<128xf32>
    %29 = vector.shape_cast %28 : vector<128xf32> to vector<1x128xf32>
    %cst_18 = arith.constant 0.000000e+00 : f32
    %30 = vector.broadcast %cst_18 : f32 to vector<1x128xf32>
    %31 = arith.subf %30, %29 : vector<1x128xf32>
    %c0_19 = arith.constant 0 : index
    %c0_20 = arith.constant 0 : index
    %c128 = arith.constant 128 : index
    %32 = vector.load %arg3[%c0_19, %c0_20, %c128] : memref<1x1x640xi32, #tpu.memory_space<vmem>>, vector<1x1x128xi32>
    %33 = vector.shape_cast %32 : vector<1x1x128xi32> to vector<1x128xi32>
    %34 = vector.broadcast %33 : vector<1x128xi32> to vector<128x128xi32>
    %35 = arith.cmpi eq, %13, %34 : vector<128x128xi32>
    %cst_21 = arith.constant 0.000000e+00 : f32
    %36 = vector.broadcast %cst_21 : f32 to vector<128x128xf32>
    %37 = arith.select %35, %12, %36 : vector<128x128xi1>, vector<128x128xf32>
    %cst_22 = arith.constant dense<0.000000e+00> : vector<128xf32>
    %38 = vector.multi_reduction <add>, %37, %cst_22 [0] : vector<128x128xf32> to vector<128xf32>
    %39 = vector.shape_cast %38 : vector<128xf32> to vector<1x128xf32>
    %cst_23 = arith.constant 0.000000e+00 : f32
    %40 = vector.broadcast %cst_23 : f32 to vector<1x128xf32>
    %41 = arith.subf %40, %39 : vector<1x128xf32>
    %c0_24 = arith.constant 0 : index
    %c0_25 = arith.constant 0 : index
    %c256 = arith.constant 256 : index
    %42 = vector.load %arg3[%c0_24, %c0_25, %c256] : memref<1x1x640xi32, #tpu.memory_space<vmem>>, vector<1x1x128xi32>
    %43 = vector.shape_cast %42 : vector<1x1x128xi32> to vector<1x128xi32>
    %44 = vector.broadcast %43 : vector<1x128xi32> to vector<128x128xi32>
    %45 = arith.cmpi eq, %13, %44 : vector<128x128xi32>
    %cst_26 = arith.constant 0.000000e+00 : f32
    %46 = vector.broadcast %cst_26 : f32 to vector<128x128xf32>
    %47 = arith.select %45, %12, %46 : vector<128x128xi1>, vector<128x128xf32>
    %cst_27 = arith.constant dense<0.000000e+00> : vector<128xf32>
    %48 = vector.multi_reduction <add>, %47, %cst_27 [0] : vector<128x128xf32> to vector<128xf32>
    %49 = vector.shape_cast %48 : vector<128xf32> to vector<1x128xf32>
    %cst_28 = arith.constant 0.000000e+00 : f32
    %50 = vector.broadcast %cst_28 : f32 to vector<1x128xf32>
    %51 = arith.subf %50, %49 : vector<1x128xf32>
    %c0_29 = arith.constant 0 : index
    %c0_30 = arith.constant 0 : index
    %c384 = arith.constant 384 : index
    %52 = vector.load %arg3[%c0_29, %c0_30, %c384] : memref<1x1x640xi32, #tpu.memory_space<vmem>>, vector<1x1x128xi32>
    %53 = vector.shape_cast %52 : vector<1x1x128xi32> to vector<1x128xi32>
    %54 = vector.broadcast %53 : vector<1x128xi32> to vector<128x128xi32>
    %55 = arith.cmpi eq, %13, %54 : vector<128x128xi32>
    %cst_31 = arith.constant 0.000000e+00 : f32
    %56 = vector.broadcast %cst_31 : f32 to vector<128x128xf32>
    %57 = arith.select %55, %12, %56 : vector<128x128xi1>, vector<128x128xf32>
    %cst_32 = arith.constant dense<0.000000e+00> : vector<128xf32>
    %58 = vector.multi_reduction <add>, %57, %cst_32 [0] : vector<128x128xf32> to vector<128xf32>
    %59 = vector.shape_cast %58 : vector<128xf32> to vector<1x128xf32>
    %cst_33 = arith.constant 0.000000e+00 : f32
    %60 = vector.broadcast %cst_33 : f32 to vector<1x128xf32>
    %61 = arith.subf %60, %59 : vector<1x128xf32>
    %c0_34 = arith.constant 0 : index
    %c0_35 = arith.constant 0 : index
    %c512 = arith.constant 512 : index
    %62 = vector.load %arg3[%c0_34, %c0_35, %c512] : memref<1x1x640xi32, #tpu.memory_space<vmem>>, vector<1x1x128xi32>
    %63 = vector.shape_cast %62 : vector<1x1x128xi32> to vector<1x128xi32>
    %64 = vector.broadcast %63 : vector<1x128xi32> to vector<128x128xi32>
    %65 = arith.cmpi eq, %13, %64 : vector<128x128xi32>
    %cst_36 = arith.constant 0.000000e+00 : f32
    %66 = vector.broadcast %cst_36 : f32 to vector<128x128xf32>
    %67 = arith.select %65, %12, %66 : vector<128x128xi1>, vector<128x128xf32>
    %cst_37 = arith.constant dense<0.000000e+00> : vector<128xf32>
    %68 = vector.multi_reduction <add>, %67, %cst_37 [0] : vector<128x128xf32> to vector<128xf32>
    %69 = vector.shape_cast %68 : vector<128xf32> to vector<1x128xf32>
    %cst_38 = arith.constant 0.000000e+00 : f32
    %70 = vector.broadcast %cst_38 : f32 to vector<1x128xf32>
    %71 = arith.subf %70, %69 : vector<1x128xf32>
    %72 = tpu.concatenate %21, %31, %41, %51, %61, %71 in 0 : vector<1x128xf32>, vector<1x128xf32>, vector<1x128xf32>, vector<1x128xf32>, vector<1x128xf32>, vector<1x128xf32> -> vector<6x128xf32>
    %cst_39 = arith.constant 0.000000e+00 : f32
    %73 = vector.broadcast %cst_39 : f32 to vector<6x128xf32>
    %74 = arith.subf %73, %72 : vector<6x128xf32>
    %75 = math.exp %74 : vector<6x128xf32>
    %cst_40 = arith.constant 1.000000e+00 : f32
    %76 = vector.broadcast %cst_40 : f32 to vector<6x128xf32>
    %77 = arith.addf %76, %75 : vector<6x128xf32>
    %78 = tpu.reciprocal %77 {approx = true} : vector<6x128xf32> -> vector<6x128xf32>
    %79 = vector.extract_strided_slice %78 {offsets = [0, 0], sizes = [1, 128], strides = [1, 1]} : vector<6x128xf32> to vector<1x128xf32>
    %c0_41 = arith.constant 0 : index
    %c0_42 = arith.constant 0 : index
    %c0_43 = arith.constant 0 : index
    %80 = vector.load %arg6[%c0_41, %c0_42, %c0_43] : memref<1x1x128xf32, #tpu.memory_space<vmem>>, vector<1x1x128xf32>
    %81 = vector.shape_cast %80 : vector<1x1x128xf32> to vector<1x128xf32>
    %82 = vector.shape_cast %79 : vector<1x128xf32> to vector<1x1x128xf32>
    tpu.vector_store %arg6[%c0_41, %c0_42, %c0_43], %82 {strides = array<i32>} : memref<1x1x128xf32, #tpu.memory_space<vmem>>, vector<1x1x128xf32>,
    %83 = vector.extract_strided_slice %78 {offsets = [1, 0], sizes = [1, 128], strides = [1, 1]} : vector<6x128xf32> to vector<1x128xf32>
    %c0_44 = arith.constant 0 : index
    %c0_45 = arith.constant 0 : index
    %c0_46 = arith.constant 0 : index
    %84 = vector.load %arg7[%c0_44, %c0_45, %c0_46] : memref<1x1x640xf32, #tpu.memory_space<vmem>>, vector<1x1x128xf32>
    %85 = vector.shape_cast %84 : vector<1x1x128xf32> to vector<1x128xf32>
    %86 = vector.shape_cast %83 : vector<1x128xf32> to vector<1x1x128xf32>
    tpu.vector_store %arg7[%c0_44, %c0_45, %c0_46], %86 {strides = array<i32>} : memref<1x1x640xf32, #tpu.memory_space<vmem>>, vector<1x1x128xf32>,
    %87 = vector.extract_strided_slice %78 {offsets = [2, 0], sizes = [1, 128], strides = [1, 1]} : vector<6x128xf32> to vector<1x128xf32>
    %c0_47 = arith.constant 0 : index
    %c0_48 = arith.constant 0 : index
    %c128_49 = arith.constant 128 : index
    %88 = vector.load %arg7[%c0_47, %c0_48, %c128_49] : memref<1x1x640xf32, #tpu.memory_space<vmem>>, vector<1x1x128xf32>
    %89 = vector.shape_cast %88 : vector<1x1x128xf32> to vector<1x128xf32>
    %90 = vector.shape_cast %87 : vector<1x128xf32> to vector<1x1x128xf32>
    tpu.vector_store %arg7[%c0_47, %c0_48, %c128_49], %90 {strides = array<i32>} : memref<1x1x640xf32, #tpu.memory_space<vmem>>, vector<1x1x128xf32>,
    %91 = vector.extract_strided_slice %78 {offsets = [3, 0], sizes = [1, 128], strides = [1, 1]} : vector<6x128xf32> to vector<1x128xf32>
    %c0_50 = arith.constant 0 : index
    %c0_51 = arith.constant 0 : index
    %c256_52 = arith.constant 256 : index
    %92 = vector.load %arg7[%c0_50, %c0_51, %c256_52] : memref<1x1x640xf32, #tpu.memory_space<vmem>>, vector<1x1x128xf32>
    %93 = vector.shape_cast %92 : vector<1x1x128xf32> to vector<1x128xf32>
    %94 = vector.shape_cast %91 : vector<1x128xf32> to vector<1x1x128xf32>
    tpu.vector_store %arg7[%c0_50, %c0_51, %c256_52], %94 {strides = array<i32>} : memref<1x1x640xf32, #tpu.memory_space<vmem>>, vector<1x1x128xf32>,
    %95 = vector.extract_strided_slice %78 {offsets = [4, 0], sizes = [1, 128], strides = [1, 1]} : vector<6x128xf32> to vector<1x128xf32>
    %c0_53 = arith.constant 0 : index
    %c0_54 = arith.constant 0 : index
    %c384_55 = arith.constant 384 : index
    %96 = vector.load %arg7[%c0_53, %c0_54, %c384_55] : memref<1x1x640xf32, #tpu.memory_space<vmem>>, vector<1x1x128xf32>
    %97 = vector.shape_cast %96 : vector<1x1x128xf32> to vector<1x128xf32>
    %98 = vector.shape_cast %95 : vector<1x128xf32> to vector<1x1x128xf32>
    tpu.vector_store %arg7[%c0_53, %c0_54, %c384_55], %98 {strides = array<i32>} : memref<1x1x640xf32, #tpu.memory_space<vmem>>, vector<1x1x128xf32>,
    %99 = vector.extract_strided_slice %78 {offsets = [5, 0], sizes = [1, 128], strides = [1, 1]} : vector<6x128xf32> to vector<1x128xf32>
    %c0_56 = arith.constant 0 : index
    %c0_57 = arith.constant 0 : index
    %c512_58 = arith.constant 512 : index
    %100 = vector.load %arg7[%c0_56, %c0_57, %c512_58] : memref<1x1x640xf32, #tpu.memory_space<vmem>>, vector<1x1x128xf32>
    %101 = vector.shape_cast %100 : vector<1x1x128xf32> to vector<1x128xf32>
    %102 = vector.shape_cast %99 : vector<1x128xf32> to vector<1x1x128xf32>
    tpu.vector_store %arg7[%c0_56, %c0_57, %c512_58], %102 {strides = array<i32>} : memref<1x1x640xf32, #tpu.memory_space<vmem>>, vector<1x1x128xf32>,
    return
  }
  func.func @transform_0(%arg0: i32) -> (i32, i32) {
    %c0_i32 = arith.constant 0 : i32
    %c0_i32_0 = arith.constant 0 : i32
    return %arg0, %c0_i32 : i32, i32
  }
  func.func @transform_1(%arg0: i32) -> (i32, i32, i32) {
    %c0_i32 = arith.constant 0 : i32
    %c0_i32_0 = arith.constant 0 : i32
    %c0_i32_1 = arith.constant 0 : i32
    return %arg0, %c0_i32, %c0_i32_0 : i32, i32, i32
  }
  func.func @transform_2(%arg0: i32) -> (i32, i32, i32) {
    %c0_i32 = arith.constant 0 : i32
    %c0_i32_0 = arith.constant 0 : i32
    %c0_i32_1 = arith.constant 0 : i32
    return %arg0, %c0_i32, %c0_i32_0 : i32, i32, i32
  }
  func.func @transform_3(%arg0: i32) -> (i32, i32) {
    %c0_i32 = arith.constant 0 : i32
    %c0_i32_0 = arith.constant 0 : i32
    %c0_i32_1 = arith.constant 0 : i32
    return %c0_i32, %c0_i32_0 : i32, i32
  }
  func.func @transform_4(%arg0: i32) -> (i32, i32) {
    %c0_i32 = arith.constant 0 : i32
    %c0_i32_0 = arith.constant 0 : i32
    %c0_i32_1 = arith.constant 0 : i32
    return %c0_i32, %c0_i32_0 : i32, i32
  }
  func.func @transform_5(%arg0: i32) -> (i32, i32, i32) {
    %c0_i32 = arith.constant 0 : i32
    %c0_i32_0 = arith.constant 0 : i32
    %c0_i32_1 = arith.constant 0 : i32
    return %arg0, %c0_i32, %c0_i32_0 : i32, i32, i32
  }
  func.func @transform_6(%arg0: i32) -> (i32, i32, i32) {
    %c0_i32 = arith.constant 0 : i32
    %c0_i32_0 = arith.constant 0 : i32
    %c0_i32_1 = arith.constant 0 : i32
    return %arg0, %c0_i32, %c0_i32_0 : i32, i32, i32
  }
}

</mosaic_0001>

<bundles_post_ra>
// kernel: sgns_forward.1
= control target key start
LH: loop header
LB: loop body
LE: loop exit
PB: predicated region body
PF: predicated region fallthrough
CT: control target
= control target key end

     0   :  { %v1131_v0 = vmov 0   ;;  %v39_v25 = vlaneseq  ;;  %v1132_v31 = vmov 1.0|1.0   ;;  %s1918_s0 = inlined_call_operand.vmem [shape: s32[128,1], index: 0, kind: input, shape index: {}]   ;;  %s1919_s3 = inlined_call_operand.vmem [shape: bf16[128,32], index: 3, kind: input, shape index: {}]   ;;  %s1920_s4 = inlined_call_operand.vmem [shape: bf16[128,32], index: 4, kind: input, shape index: {}]   ;;  %s1921_s1 = inlined_call_operand.vmem [shape: s32[1,1,128], index: 1, kind: input, shape index: {}]   ;;  %s1922_s2 = inlined_call_operand.vmem [shape: s32[1,1,640], index: 2, kind: input, shape index: {}]   ;;  %s1923_s5 = inlined_call_operand.vmem [shape: f32[1,1,128], index: 5, kind: output, shape index: {0}]   ;;  %s1924_s6 = inlined_call_operand.vmem [shape: f32[1,1,640], index: 6, kind: output, shape index: {1}]  }
   0x1   :  { %1110 = vset.pattern.permute.xlu1 %v1131_v0  ;;  %1109 = vset.pattern.permute.xlu0 %v1131_v0  ;;  %v25_v1 = vld [vmem:[%s1918_s0 + $0x10] sm:$0xff]  ;;  %v23_v2 = vld [vmem:[%s1918_s0] sm:$0xff]  ;;  %v26_v3 = vld [vmem:[%s1918_s0 + $0x18] sm:$0xff] }
   0x2   :  { %48 = vperm.xlu1 %1110, %v25_v1   ;;  %42 = vperm.xlu0 %1109, %v23_v2   ;;  %v24_v4 = vld [vmem:[%s1918_s0 + $0x8] sm:$0xff]  ;;  %v27_v6 = vld [vmem:[%s1918_s0 + $0x20] sm:$0xff]  ;;  %v30_v9 = vld [vmem:[%s1918_s0 + $0x38] sm:$0xff]  ;;  %v40_v28 = vand.u32 127, %v39_v25 }
   0x3   :  { %v28_v5 = vld [vmem:[%s1918_s0 + $0x28] sm:$0xff]  ;;  %v1111_v7 = vld [vmem:[%s1919_s3] sm:$0xff]   ;;  %v29_v10 = vld [vmem:[%s1918_s0 + $0x30] sm:$0xff] }
   0x4   :  { %v1112_v8 = vld [vmem:[%s1919_s3 + $0x8] sm:$0xff]   ;;  %1034 = vmatprep.subr.bf16.mxu0 %v1111_v7  ;;  %v1113_v11 = vld [vmem:[%s1919_s3 + $0x10] sm:$0xff]   ;;  %v31_v13 = vld [vmem:[%s1918_s0 + $0x40] sm:$0xff] }
   0x5   :  { %1035 = vmatpush3.bf16.msra.mxu0 %v1111_v7  ;;  %v32_v12 = vld [vmem:[%s1918_s0 + $0x48] sm:$0xff]  ;;  %v1114_v14 = vld [vmem:[%s1919_s3 + $0x18] sm:$0xff]   ;;  %v33_v16 = vld [vmem:[%s1918_s0 + $0x50] sm:$0xff] }
   0x6   :  { %51 = vperm.xlu1 %1110, %v26_v3   ;;  %45 = vperm.xlu0 %1109, %v24_v4   ;;  %v34_v15 = vld [vmem:[%s1918_s0 + $0x58] sm:$0xff]  ;;  %v1115_v17 = vld [vmem:[%s1919_s3 + $0x20] sm:$0xff]   ;;  %v36_v18 = vld [vmem:[%s1918_s0 + $0x68] sm:$0xff] }
   0x7   :  { %1036 = vmatprep.subr.bf16.mxu0 %v1112_v8  ;;  %v35_v19 = vld [vmem:[%s1918_s0 + $0x60] sm:$0xff]  ;;  %v1116_v20 = vld [vmem:[%s1919_s3 + $0x28] sm:$0xff]   ;;  %v38_v21 = vld [vmem:[%s1918_s0 + $0x78] sm:$0xff] }
   0x8   :  { %v37_v22 = vld [vmem:[%s1918_s0 + $0x70] sm:$0xff]  ;;  %v1118_v24 = vld [vmem:[%s1919_s3 + $0x38] sm:$0xff]   ;;  %v1119_v44 = vld [vmem:[%s1920_s4] sm:$0xff]  }
   0x9   :  { %1037 = vmatpush3.bf16.msra.mxu0 %v1112_v8  ;;  %v1117_v23 = vld [vmem:[%s1919_s3 + $0x30] sm:$0xff]  }
   0xa   :  { %57 = vperm.xlu1 %1110, %v28_v5   ;;  %54 = vperm.xlu0 %1109, %v27_v6  }
   0xb   :  { %1038 = vmatprep.subr.bf16.mxu0 %v1113_v11 }
   0xd   :  { %1039 = vmatpush3.bf16.msra.mxu0 %v1113_v11 }
   0xe   :  { %63 = vperm.xlu1 %1110, %v30_v9   ;;  %60 = vperm.xlu0 %1109, %v29_v10  }
   0xf   :  { %1040 = vmatprep.subr.bf16.mxu0 %v1114_v14 }
  0x11   :  { %1041 = vmatpush3.bf16.msra.mxu0 %v1114_v14  ;;  %v1121_v14 = vld [vmem:[%s1920_s4 + $0x10] sm:$0xff]  }
  0x12   :  { %69 = vperm.xlu1 %1110, %v32_v12   ;;  %66 = vperm.xlu0 %1109, %v31_v13   ;;  %v1120_v13 = vld [vmem:[%s1920_s4 + $0x8] sm:$0xff]  }
  0x13   :  { %1042 = vmatprep.subr.bf16.mxu0 %v1115_v17 }
  0x15   :  { %1043 = vmatpush3.bf16.msra.mxu0 %v1115_v17  ;;  %v1124_v17 = vld [vmem:[%s1920_s4 + $0x28] sm:$0xff]  }
  0x16   :  { %75 = vperm.xlu1 %1110, %v34_v15   ;;  %72 = vperm.xlu0 %1109, %v33_v16   ;;  %v1122_v15 = vld [vmem:[%s1920_s4 + $0x18] sm:$0xff]   ;;  %v1123_v16 = vld [vmem:[%s1920_s4 + $0x20] sm:$0xff]  }
  0x17   :  { %1044 = vmatprep.subr.bf16.mxu0 %v1116_v20 }
  0x19   :  { %1045 = vmatpush3.bf16.msra.mxu0 %v1116_v20  ;;  %v1291_v20 = vshrl.u32 %v39_v25, 7 }
  0x1a   :  { %81 = vperm.xlu1 %1110, %v36_v18   ;;  %78 = vperm.xlu0 %1109, %v35_v19   ;;  %v1125_v18 = vld [vmem:[%s1920_s4 + $0x30] sm:$0xff]   ;;  %v1126_v19 = vld [vmem:[%s1920_s4 + $0x38] sm:$0xff]  }
  0x1b   :  { %1046 = vmatprep.subr.bf16.mxu0 %v1117_v23 }
  0x1d   :  { %1047 = vmatpush3.bf16.msra.mxu0 %v1117_v23  ;;  %v1302_v23 = vld [vmem:[%s1922_s2] ss:$0 sm:$0xff] }
  0x1e   :  { %87 = vperm.xlu1 %1110, %v38_v21   ;;  %84 = vperm.xlu0 %1109, %v37_v22   ;;  %v503_v21 = vadd.s32 16, %v1291_v20  ;;  %v1297_v22 = vld [vmem:[%s1921_s1] ss:$0 sm:$0xff] }
  0x1f   :  { %1048 = vmatprep.subr.bf16.mxu0 %v1118_v24 }
  0x21   :  { %1049 = vmatpush3.bf16.msra.mxu0 %v1118_v24  ;;  %v1307_v24 = vld [vmem:[%s1922_s2 + $0x1] ss:$0 sm:$0xff] }
  0x81   :  { %v49_v26 = vpop.permute.xlu1 %48  ;;  %v43_v27 = vpop.permute.xlu0 %42 }
  0x82   :  { %vm91_vm0 = vcmp.eq.s32.totalorder %v40_v28, %v49_v26  ;;  %vm89_vm3 = vcmp.eq.s32.totalorder %v40_v28, %v43_v27  ;;  %v1312_v26 = vld [vmem:[%s1922_s2 + $0x2] ss:$0 sm:$0xff]  ;;  %v1317_v27 = vld [vmem:[%s1922_s2 + $0x3] ss:$0 sm:$0xff] }
  0x85   :  { %v52_v29 = vpop.permute.xlu1 %51  ;;  %v46_v30 = vpop.permute.xlu0 %45 }
  0x86   :  { %vm92_vm1 = vcmp.eq.s32.totalorder %v40_v28, %v52_v29  ;;  %vm90_vm2 = vcmp.eq.s32.totalorder %v40_v28, %v46_v30  ;;  %v1326_v29 = vadd.s32 24, %v1291_v20  ;;  %v1329_v30 = vadd.s32 8, %v1291_v20 }
  0x87   :  { %vm966_vm4 = vmpackc.low %vm92_vm1, %vm91_vm0 }
  0x88   :  { %vm964_vm5 = vmpackc.low %vm90_vm2, %vm89_vm3 }
  0x89   :  { %1050 = vmatprep.mubr.msk.bf16.mxu0 %vm964_vm5, %v1132_v31  ;;  %v58_v32 = vpop.permute.xlu1 %57  ;;  %v55_v33 = vpop.permute.xlu0 %54 }
  0x8a   :  { %vm94_vm6 = vcmp.eq.s32.totalorder %v40_v28, %v58_v32  ;;  %1051 = vmatmul.mubr.msk.bf16.vlgmr.msra.gmra.mrb[0].mxu0 %vm966_vm4, %v1132_v31  ;;  %vm93_vm7 = vcmp.eq.s32.totalorder %v40_v28, %v55_v33  ;;  %v1372_v32 = vadd.s32 48, %v1291_v20 }
  0x8b   :  { %vm968_vm8 = vmpackc.low %vm94_vm6, %vm93_vm7 }
  0x8c   :  { %1054 = vmatprep.mubr.msk.bf16.mxu0 %vm968_vm8, %v1132_v31  ;;  %vm354_vm8 = vcmask 261120  }
  0x8d   :  { %v64_v34 = vpop.permute.xlu1 %63  ;;  %v61_v35 = vpop.permute.xlu0 %60  ;;  %1082 = vmatprep.mubr.msk.bf16.mxu1 %vm354_vm8, %v1119_v44 }
  0x8e   :  { %vm96_vm9 = vcmp.eq.s32.totalorder %v40_v28, %v64_v34  ;;  %vm95_vm10 = vcmp.eq.s32.totalorder %v40_v28, %v61_v35  ;;  %v1381_v34 = vadd.s32 56, %v1291_v20  ;;  %v1384_v35 = vadd.s32 40, %v1291_v20 }
  0x8f   :  { %vm970_vm11 = vmpackc.low %vm96_vm9, %vm95_vm10  ;;  %vm524_vm9 = vcmp.eq.s32.totalorder %v503_v21, %v1297_v22  ;;  %vm582_vm10 = vcmp.eq.s32.totalorder %v503_v21, %v1302_v23 }
  0x91   :  { %v70_v36 = vpop.permute.xlu1 %69  ;;  %v67_v37 = vpop.permute.xlu0 %66 }
  0x92   :  { %vm98_vm12 = vcmp.eq.s32.totalorder %v40_v28, %v70_v36  ;;  %1055 = vmatmul.mubr.msk.bf16.gmra.mrb[4].mxu0 %vm970_vm11, %v1132_v31  ;;  %vm97_vm13 = vcmp.eq.s32.totalorder %v40_v28, %v67_v37  ;;  %vm641_vm11 = vcmp.eq.s32.totalorder %v503_v21, %v1307_v24  ;;  %v1387_v36 = vadd.s32 80, %v1291_v20 }
  0x93   :  { %vm972_vm14 = vmpackc.low %vm98_vm12, %vm97_vm13  ;;  %vm700_vm12 = vcmp.eq.s32.totalorder %v503_v21, %v1312_v26  ;;  %vm759_vm13 = vcmp.eq.s32.totalorder %v503_v21, %v1317_v27 }
  0x94   :  { %1058 = vmatprep.mubr.msk.bf16.mxu0 %vm972_vm14, %v1132_v31 }
  0x95   :  { %v76_v38 = vpop.permute.xlu1 %75  ;;  %v73_v39 = vpop.permute.xlu0 %72 }
  0x96   :  { %vm100_vm15 = vcmp.eq.s32.totalorder %v40_v28, %v76_v38  ;;  %vm99_vm0 = vcmp.eq.s32.totalorder %v40_v28, %v73_v39  ;;  %v1394_v38 = vadd.s32 64, %v1291_v20  ;;  %v1397_v39 = vadd.s32 88, %v1291_v20 }
  0x97   :  { %vm974_vm1 = vmpackc.low %vm100_vm15, %vm99_vm0  ;;  %vm522_vm15 = vcmp.eq.s32.totalorder %v1291_v20, %v1297_v22  ;;  %vm580_vm0 = vcmp.eq.s32.totalorder %v1291_v20, %v1302_v23 }
  0x99   :  { %v82_v40 = vpop.permute.xlu1 %81  ;;  %v79_v41 = vpop.permute.xlu0 %78 }
  0x9a   :  { %vm102_vm2 = vcmp.eq.s32.totalorder %v40_v28, %v82_v40  ;;  %1059 = vmatmul.mubr.msk.bf16.gmra.mrb[8].mxu0 %vm974_vm1, %v1132_v31  ;;  %vm101_vm3 = vcmp.eq.s32.totalorder %v40_v28, %v79_v41  ;;  %vm639_vm1 = vcmp.eq.s32.totalorder %v1291_v20, %v1307_v24  ;;  %v1400_v40 = vadd.s32 72, %v1291_v20 }
  0x9b   :  { %vm976_vm4 = vmpackc.low %vm102_vm2, %vm101_vm3  ;;  %v1403_v41 = vadd.s32 112, %v1291_v20 }
  0x9c   :  { %1062 = vmatprep.mubr.msk.bf16.mxu0 %vm976_vm4, %v1132_v31 }
  0x9d   :  { %v88_v42 = vpop.permute.xlu1 %87  ;;  %v85_v43 = vpop.permute.xlu0 %84 }
  0x9e   :  { %vm104_vm5 = vcmp.eq.s32.totalorder %v40_v28, %v88_v42  ;;  %vm103_vm6 = vcmp.eq.s32.totalorder %v40_v28, %v85_v43  ;;  %v1322_v28 = vld [vmem:[%s1922_s2 + $0x4] ss:$0 sm:$0xff] }
  0x9f   :  { %vm978_vm7 = vmpackc.low %vm104_vm5, %vm103_vm6  ;;  %vm818_vm14 = vcmp.eq.s32.totalorder %v503_v21, %v1322_v28  ;;  %vm699_vm5 = vcmp.eq.s32.totalorder %v1329_v30, %v1312_v26  ;;  %vm758_vm6 = vcmp.eq.s32.totalorder %v1329_v30, %v1317_v27  ;;  %vm819_vm3 = vcmp.eq.s32.totalorder %v1326_v29, %v1322_v28 }
  0xa2   :  { %1063 = vmatmul.mubr.msk.bf16.gmra.mrb[12].mxu0 %vm978_vm7, %v1132_v31  ;;  %v1341_v31 = vadd.s32 32, %v1291_v20 }
  0xa4   :  { %vm526_vm4 = vcmp.eq.s32.totalorder %v1341_v31, %v1297_v22  ;;  %vm702_vm2 = vcmp.eq.s32.totalorder %v1341_v31, %v1312_v26  ;;  %vm761_vm7 = vcmp.eq.s32.totalorder %v1341_v31, %v1317_v27 }
 0x15d   :  { %v1052_v45 = vpop.f32.mrb[0].mxu0 }
 0x15e   :  { %v227_v46 = vpop.f32.mrb[1].mxu0 }
 0x15f   :  { %v1053_v47 = vpop.f32.mrb[2].mxu0 }
 0x160   :  { %v307_v48 = vpack.c.bf16 %v1053_v47, %v1052_v45  ;;  %v230_v49 = vpop.f32.mrb[3].mxu0  ;;  %v1414_v45 = vadd.s32 96, %v1291_v20 }
 0x161   :  { %v306_v50 = vpack.c.bf16 %v230_v49, %v227_v46  ;;  %v1417_v46 = vadd.s32 104, %v1291_v20 }
 0x162   :  { %v383_v58 = vsel %vm354_vm8, %v307_v48, 0 }
 0x163   :  { %1098 = vmatprep.subr.msk.bf16.mxu1 %vm354_vm8, %v306_v50  ;;  %v380_v51 = vsel %vm354_vm8, %v306_v50, 0 }
 0x164   :  { %1067 = vmatpush3.bf16.xpose.msra.mxu1 %v380_v51 }
 0x165   :  { %v1056_v52 = vpop.f32.mrb[4].mxu0  ;;  %1099 = vmatprep.subr.msk.bf16.mxu1 %vm354_vm8, %v307_v48 }
 0x166   :  { %v243_v53 = vpop.f32.mrb[5].mxu0 }
 0x167   :  { %v1057_v54 = vpop.f32.mrb[6].mxu0 }
 0x168   :  { %v309_v55 = vpack.c.bf16 %v1057_v54, %v1056_v52  ;;  %v246_v56 = vpop.f32.mrb[7].mxu0 }
 0x169   :  { %v308_v57 = vpack.c.bf16 %v246_v56, %v243_v53 }
 0x16a   :  { %v389_v8 = vsel %vm354_vm8, %v309_v55, 0 }
 0x16b   :  { %v386_v1 = vsel %vm354_vm8, %v308_v57, 0 }
 0x16c   :  { %1069 = vmatpush3.bf16.xpose.msra.mxu1 %v383_v58 }
 0x16d   :  { %v1060_v59 = vpop.f32.mrb[8].mxu0  ;;  %1100 = vmatprep.subr.msk.bf16.mxu1 %vm354_vm8, %v308_v57 }
 0x16e   :  { %v259_v60 = vpop.f32.mrb[9].mxu0 }
 0x16f   :  { %v1061_v61 = vpop.f32.mrb[10].mxu0 }
 0x170   :  { %v311_v62 = vpack.c.bf16 %v1061_v61, %v1060_v59  ;;  %v262_v63 = vpop.f32.mrb[11].mxu0 }
 0x171   :  { %v310_v0 = vpack.c.bf16 %v262_v63, %v259_v60 }
 0x172   :  { %v395_v10 = vsel %vm354_vm8, %v311_v62, 0 }
 0x173   :  { %v392_v9 = vsel %vm354_vm8, %v310_v0, 0 }
 0x174   :  { %1071 = vmatpush3.bf16.xpose.msra.mxu1 %v386_v1 }
 0x175   :  { %v1064_v2 = vpop.f32.mrb[12].mxu0  ;;  %1101 = vmatprep.subr.msk.bf16.mxu1 %vm354_vm8, %v309_v55 }
 0x176   :  { %v275_v3 = vpop.f32.mrb[13].mxu0 }
 0x177   :  { %v1065_v4 = vpop.f32.mrb[14].mxu0 }
 0x178   :  { %v313_v5 = vpack.c.bf16 %v1065_v4, %v1064_v2  ;;  %v278_v6 = vpop.f32.mrb[15].mxu0 }
 0x179   :  { %v312_v7 = vpack.c.bf16 %v278_v6, %v275_v3 }
 0x17a   :  { %v401_v12 = vsel %vm354_vm8, %v313_v5, 0 }
 0x17b   :  { %v398_v11 = vsel %vm354_vm8, %v312_v7, 0 }
 0x17c   :  { %1073 = vmatpush3.bf16.xpose.msra.mxu1 %v389_v8 }
 0x17d   :  { %1102 = vmatprep.subr.msk.bf16.mxu1 %vm354_vm8, %v310_v0 }
 0x184   :  { %1075 = vmatpush3.bf16.xpose.msra.mxu1 %v392_v9 }
 0x185   :  { %1103 = vmatprep.subr.msk.bf16.mxu1 %vm354_vm8, %v311_v62 }
 0x18c   :  { %1077 = vmatpush3.bf16.xpose.msra.mxu1 %v395_v10 }
 0x18d   :  { %1104 = vmatprep.subr.msk.bf16.mxu1 %vm354_vm8, %v312_v7 }
 0x194   :  { %1079 = vmatpush3.bf16.xpose.msra.mxu1 %v398_v11 }
 0x195   :  { %1105 = vmatprep.subr.msk.bf16.mxu1 %vm354_vm8, %v313_v5 }
 0x19c   :  { %1081 = vmatpush3.bf16.xpose.msra.mxu1 %v401_v12 }
 0x1a3   :  { %1083 = vmatmul.mubr.msk.bf16.vlgmr.msra.gmra.mrb[0].mxu1 %vm354_vm8, %v1120_v13 }
 0x1a4   :  { %1086 = vmatprep.mubr.msk.bf16.mxu1 %vm354_vm8, %v1121_v14 }
 0x1ab   :  { %1087 = vmatmul.mubr.msk.bf16.gmra.mrb[4].mxu1 %vm354_vm8, %v1122_v15 }
 0x1ac   :  { %1090 = vmatprep.mubr.msk.bf16.mxu1 %vm354_vm8, %v1123_v16 }
 0x1b3   :  { %1091 = vmatmul.mubr.msk.bf16.gmra.mrb[8].mxu1 %vm354_vm8, %v1124_v17 }
 0x1b4   :  { %1094 = vmatprep.mubr.msk.bf16.mxu1 %vm354_vm8, %v1125_v18 }
 0x1bb   :  { %1095 = vmatmul.mubr.msk.bf16.gmra.mrb[12].mxu1 %vm354_vm8, %v1126_v19  ;;  %vm581_vm8 = vcmp.eq.s32.totalorder %v1329_v30, %v1302_v23 }
 0x276   :  { %v1084_v33 = vpop.f32.mrb[0].mxu1 }
 0x277   :  { %v437_v37 = vpop.f32.mrb[1].mxu1  ;;  %v540_v42 = vsel %vm524_vm9, %v1084_v33, 0.0  ;;  %v598_v43 = vsel %vm582_vm10, %v1084_v33, 0.0  ;;  %v657_v47 = vsel %vm641_vm11, %v1084_v33, 0.0  ;;  %v716_v48 = vsel %vm700_vm12, %v1084_v33, 0.0 }
 0x278   :  { %v1085_v44 = vpop.f32.mrb[2].mxu1  ;;  %v775_v49 = vsel %vm759_vm13, %v1084_v33, 0.0  ;;  %v834_v50 = vsel %vm818_vm14, %v1084_v33, 0.0  ;;  %vm820_vm9 = vcmp.eq.s32.totalorder %v1341_v31, %v1322_v28  ;;  %v538_v52 = vsel %vm522_vm15, %v437_v37, 0.0 }
 0x279   :  { %v440_v51 = vpop.f32.mrb[3].mxu1  ;;  %v596_v53 = vsel %vm580_vm0, %v437_v37, 0.0  ;;  %v655_v54 = vsel %vm639_vm1, %v437_v37, 0.0  ;;  %vm1925_vm10 = vcmp.eq.s32.totalorder %v1291_v20, %v1312_v26  ;;  %vm528_vm11 = vcmp.eq.s32.totalorder %v1372_v32, %v1297_v22 }
 0x27a   :  { %v714_v55 = vsel %vm1925_vm10, %v437_v37, 0.0  ;;  %vm586_vm12 = vcmp.eq.s32.totalorder %v1372_v32, %v1302_v23  ;;  %vm1926_vm13 = vcmp.eq.s32.totalorder %v1291_v20, %v1317_v27  ;;  %vm1927_vm14 = vcmp.eq.s32.totalorder %v1291_v20, %v1322_v28 }
 0x27b   :  { %v773_v56 = vsel %vm1926_vm13, %v437_v37, 0.0  ;;  %v832_v57 = vsel %vm1927_vm14, %v437_v37, 0.0  ;;  %vm1928_vm15 = vcmp.eq.s32.totalorder %v1329_v30, %v1297_v22  ;;  %v597_v59 = vsel %vm581_vm8, %v440_v51, 0.0 }
 0x27c   :  { %v539_v58 = vsel %vm1928_vm15, %v440_v51, 0.0  ;;  %vm645_vm0 = vcmp.eq.s32.totalorder %v1372_v32, %v1307_v24  ;;  %vm704_vm1 = vcmp.eq.s32.totalorder %v1372_v32, %v1312_v26  ;;  %vm763_vm10 = vcmp.eq.s32.totalorder %v1372_v32, %v1317_v27 }
 0x27d   :  { %v554_v60 = vadd.f32 %v539_v58, %v538_v52  ;;  %v612_v61 = vadd.f32 %v597_v59, %v596_v53  ;;  %vm1929_vm13 = vcmp.eq.s32.totalorder %v1329_v30, %v1307_v24  ;;  %v715_v63 = vsel %vm699_vm5, %v440_v51, 0.0 }
 0x27e   :  { %v656_v62 = vsel %vm1929_vm13, %v440_v51, 0.0  ;;  %vm527_vm14 = vcmp.eq.s32.totalorder %v1384_v35, %v1297_v22  ;;  %v730_v1 = vadd.f32 %v715_v63, %v714_v55  ;;  %v774_v2 = vsel %vm758_vm6, %v440_v51, 0.0  ;;  %v1088_v8 = vpop.f32.mrb[4].mxu1 }
 0x27f   :  { %v671_v0 = vadd.f32 %v656_v62, %v655_v54  ;;  %vm1930_vm13 = vcmp.eq.s32.totalorder %v1329_v30, %v1322_v28  ;;  %v555_v4 = vadd.f32 %v554_v60, %v540_v42  ;;  %v613_v5 = vadd.f32 %v612_v61, %v598_v43  ;;  %v453_v13 = vpop.f32.mrb[5].mxu1 }
 0x280   :  { %v833_v3 = vsel %vm1930_vm13, %v440_v51, 0.0  ;;  %v789_v6 = vadd.f32 %v774_v2, %v773_v56  ;;  %vm1931_vm13 = vcmp.eq.s32.totalorder %v1326_v29, %v1297_v22  ;;  %vm1932_vm5 = vcmp.eq.s32.totalorder %v1326_v29, %v1302_v23  ;;  %v1501_v18 = vpop.f32.mrb[6].mxu1 }
 0x281   :  { %v848_v7 = vadd.f32 %v833_v3, %v832_v57  ;;  %v541_v9 = vsel %vm1931_vm13, %v1085_v44, 0.0  ;;  %v599_v10 = vsel %vm1932_vm5, %v1085_v44, 0.0  ;;  %v672_v11 = vadd.f32 %v671_v0, %v657_v47  ;;  %v456_v37 = vpop.f32.mrb[7].mxu1 }
 0x282   :  { %v731_v12 = vadd.f32 %v730_v1, %v716_v48  ;;  %vm1933_vm8 = vcmp.eq.s32.totalorder %v1326_v29, %v1307_v24  ;;  %vm1934_vm15 = vcmp.eq.s32.totalorder %v1326_v29, %v1312_v26  ;;  %v790_v16 = vadd.f32 %v789_v6, %v775_v49 }
 0x283   :  { %v658_v14 = vsel %vm1933_vm8, %v1085_v44, 0.0  ;;  %v717_v15 = vsel %vm1934_vm15, %v1085_v44, 0.0  ;;  %v849_v17 = vadd.f32 %v848_v7, %v834_v50  ;;  %vm529_vm13 = vcmp.eq.s32.totalorder %v1381_v34, %v1297_v22 }
 0x284   :  { %vm1935_vm6 = vcmp.eq.s32.totalorder %v1326_v29, %v1317_v27  ;;  %v835_v21 = vsel %vm819_vm3, %v1085_v44, 0.0  ;;  %v542_v30 = vsel %vm526_vm4, %v453_v13, 0.0  ;;  %v556_v33 = vadd.f32 %v555_v4, %v541_v9 }
 0x285   :  { %v776_v19 = vsel %vm1935_vm6, %v1085_v44, 0.0  ;;  %vm646_vm8 = vcmp.eq.s32.totalorder %v1381_v34, %v1307_v24  ;;  %vm1936_vm5 = vcmp.eq.s32.totalorder %v1341_v31, %v1302_v23  ;;  %v614_v43 = vadd.f32 %v613_v5, %v599_v10 }
 0x286   :  { %v600_v42 = vsel %vm1936_vm5, %v453_v13, 0.0  ;;  %vm1937_vm3 = vcmp.eq.s32.totalorder %v1341_v31, %v1307_v24  ;;  %v673_v44 = vadd.f32 %v672_v11, %v658_v14  ;;  %vm764_vm4 = vcmp.eq.s32.totalorder %v1381_v34, %v1317_v27  ;;  %v1566_v62 = vpop.f32.mrb[8].mxu1 }
 0x287   :  { %v659_v29 = vsel %vm1937_vm3, %v453_v13, 0.0  ;;  %vm823_vm6 = vcmp.eq.s32.totalorder %v1381_v34, %v1322_v28  ;;  %v557_v47 = vadd.f32 %v556_v33, %v542_v30  ;;  %v718_v48 = vsel %vm702_vm2, %v453_v13, 0.0 }
 0x288   :  { %v732_v49 = vadd.f32 %v731_v12, %v717_v15  ;;  %v777_v50 = vsel %vm761_vm7, %v453_v13, 0.0  ;;  %vm588_vm5 = vcmp.eq.s32.totalorder %v1394_v38, %v1302_v23  ;;  %vm647_vm3 = vcmp.eq.s32.totalorder %v1394_v38, %v1307_v24 }
 0x289   :  { %v615_v51 = vadd.f32 %v614_v43, %v600_v42  ;;  %v674_v52 = vadd.f32 %v673_v44, %v659_v29  ;;  %v791_v53 = vadd.f32 %v790_v16, %v776_v19  ;;  %v836_v54 = vsel %vm820_vm9, %v453_v13, 0.0 }
 0x28a   :  { %vm706_vm2 = vcmp.eq.s32.totalorder %v1394_v38, %v1312_v26  ;;  %vm765_vm15 = vcmp.eq.s32.totalorder %v1394_v38, %v1317_v27  ;;  %v544_v55 = vsel %vm528_vm11, %v1088_v8, 0.0  ;;  %v602_v56 = vsel %vm586_vm12, %v1088_v8, 0.0 }
 0x28b   :  { %v733_v57 = vadd.f32 %v732_v49, %v718_v48  ;;  %v850_v58 = vadd.f32 %v849_v17, %v835_v21  ;;  %vm824_vm7 = vcmp.eq.s32.totalorder %v1394_v38, %v1322_v28  ;;  %v661_v31 = vsel %vm645_vm0, %v1088_v8, 0.0 }
 0x28c   :  { %v720_v59 = vsel %vm704_vm1, %v1088_v8, 0.0  ;;  %v779_v60 = vsel %vm763_vm10, %v1088_v8, 0.0  ;;  %v792_v61 = vadd.f32 %v791_v53, %v777_v50  ;;  %vm1938_vm9 = vcmp.eq.s32.totalorder %v1372_v32, %v1322_v28  ;;  %v469_v32 = vpop.f32.mrb[9].mxu1 }
 0x28d   :  { %v838_v63 = vsel %vm1938_vm9, %v1088_v8, 0.0  ;;  %v851_v0 = vadd.f32 %v850_v58, %v836_v54  ;;  %v543_v1 = vsel %vm527_vm14, %v456_v37, 0.0  ;;  %vm1939_vm11 = vcmp.eq.s32.totalorder %v1384_v35, %v1302_v23  ;;  %v1591_v7 = vpop.f32.mrb[10].mxu1 }
 0x28e   :  { %v601_v2 = vsel %vm1939_vm11, %v456_v37, 0.0  ;;  %vm532_vm12 = vcmp.eq.s32.totalorder %v1387_v36, %v1297_v22  ;;  %vm590_vm0 = vcmp.eq.s32.totalorder %v1387_v36, %v1302_v23  ;;  %v558_v3 = vadd.f32 %v557_v47, %v543_v1  ;;  %v1603_v12 = vpop.f32.mrb[11].mxu1 }
 0x28f   :  { %v616_v4 = vadd.f32 %v615_v51, %v601_v2  ;;  %vm1940_vm10 = vcmp.eq.s32.totalorder %v1384_v35, %v1307_v24  ;;  %vm1941_vm14 = vcmp.eq.s32.totalorder %v1384_v35, %v1312_v26  ;;  %vm648_vm9 = vcmp.eq.s32.totalorder %v1400_v40, %v1307_v24  ;;  %v1662_v50 = vpop.f32.mrb[12].mxu1 }
 0x290   :  { %v660_v5 = vsel %vm1940_vm10, %v456_v37, 0.0  ;;  %v719_v6 = vsel %vm1941_vm14, %v456_v37, 0.0  ;;  %vm1942_vm10 = vcmp.eq.s32.totalorder %v1384_v35, %v1317_v27  ;;  %vm1943_vm14 = vcmp.eq.s32.totalorder %v1384_v35, %v1322_v28 }
 0x291   :  { %v675_v8 = vadd.f32 %v674_v52, %v660_v5  ;;  %v734_v9 = vadd.f32 %v733_v57, %v719_v6  ;;  %v778_v10 = vsel %vm1942_vm10, %v456_v37, 0.0  ;;  %v837_v11 = vsel %vm1943_vm14, %v456_v37, 0.0 }
 0x292   :  { %vm707_vm11 = vcmp.eq.s32.totalorder %v1400_v40, %v1312_v26  ;;  %v559_v13 = vadd.f32 %v558_v3, %v544_v55  ;;  %v617_v14 = vadd.f32 %v616_v4, %v602_v56  ;;  %v793_v15 = vadd.f32 %v792_v61, %v778_v10  ;;  %v1678_v55 = vpop.f32.mrb[13].mxu1 }
 0x293   :  { %v852_v16 = vadd.f32 %v851_v0, %v837_v11  ;;  %vm766_vm1 = vcmp.eq.s32.totalorder %v1400_v40, %v1317_v27  ;;  %v545_v35 = vsel %vm529_vm13, %v1501_v18, 0.0  ;;  %vm1944_vm14 = vcmp.eq.s32.totalorder %v1381_v34, %v1302_v23 }
 0x294   :  { %v603_v17 = vsel %vm1944_vm14, %v1501_v18, 0.0  ;;  %v676_v19 = vadd.f32 %v675_v8, %v661_v31  ;;  %v735_v21 = vadd.f32 %v734_v9, %v720_v59  ;;  %v662_v30 = vsel %vm646_vm8, %v1501_v18, 0.0  ;;  %v1691_v59 = vpop.f32.mrb[14].mxu1 }
 0x295   :  { %vm1945_vm10 = vcmp.eq.s32.totalorder %v1381_v34, %v1312_v26  ;;  %v794_v37 = vadd.f32 %v793_v15, %v779_v60  ;;  %v853_v42 = vadd.f32 %v852_v16, %v838_v63  ;;  %vm767_vm13 = vcmp.eq.s32.totalorder %v1387_v36, %v1317_v27  ;;  %v1702_v63 = vpop.f32.mrb[15].mxu1 }
 0x296   :  { %v721_v33 = vsel %vm1945_vm10, %v1501_v18, 0.0  ;;  %v780_v43 = vsel %vm764_vm4, %v1501_v18, 0.0  ;;  %v839_v29 = vsel %vm823_vm6, %v1501_v18, 0.0  ;;  %vm1946_vm8 = vcmp.eq.s32.totalorder %v1394_v38, %v1297_v22 }
 0x297   :  { %v546_v44 = vsel %vm1946_vm8, %v469_v32, 0.0  ;;  %v560_v47 = vadd.f32 %v559_v13, %v545_v35  ;;  %vm533_vm10 = vcmp.eq.s32.totalorder %v1397_v39, %v1297_v22  ;;  %v604_v48 = vsel %vm588_vm5, %v469_v32, 0.0 }
 0x298   :  { %v618_v49 = vadd.f32 %v617_v14, %v603_v17  ;;  %v663_v34 = vsel %vm647_vm3, %v469_v32, 0.0  ;;  %v677_v18 = vadd.f32 %v676_v19, %v662_v30  ;;  %vm650_vm4 = vcmp.eq.s32.totalorder %v1397_v39, %v1307_v24 }
 0x299   :  { %vm709_vm6 = vcmp.eq.s32.totalorder %v1397_v39, %v1312_v26  ;;  %v561_v51 = vadd.f32 %v560_v47, %v546_v44  ;;  %v722_v52 = vsel %vm706_vm2, %v469_v32, 0.0  ;;  %v736_v53 = vadd.f32 %v735_v21, %v721_v33 }
 0x29a   :  { %v781_v54 = vsel %vm765_vm15, %v469_v32, 0.0  ;;  %vm536_vm5 = vcmp.eq.s32.totalorder %v1403_v41, %v1297_v22  ;;  %v619_v56 = vadd.f32 %v618_v49, %v604_v48  ;;  %v678_v57 = vadd.f32 %v677_v18, %v663_v34 }
 0x29b   :  { %v795_v58 = vadd.f32 %v794_v37, %v780_v43  ;;  %v840_v31 = vsel %vm824_vm7, %v469_v32, 0.0  ;;  %vm830_vm2 = vcmp.eq.s32.totalorder %v1403_v41, %v1322_v28  ;;  %vm534_vm14 = vcmp.eq.s32.totalorder %v1414_v45, %v1297_v22 }
 0x29c   :  { %vm592_vm8 = vcmp.eq.s32.totalorder %v1414_v45, %v1302_v23  ;;  %v737_v60 = vadd.f32 %v736_v53, %v722_v52  ;;  %v854_v61 = vadd.f32 %v853_v42, %v839_v29  ;;  %v1700_v38 = vadd.s32 120, %v1291_v20 }
 0x29d   :  { %v548_v0 = vsel %vm532_vm12, %v1566_v62, 0.0  ;;  %v606_v1 = vsel %vm590_vm0, %v1566_v62, 0.0  ;;  %vm1947_vm7 = vcmp.eq.s32.totalorder %v1387_v36, %v1307_v24  ;;  %v796_v32 = vadd.f32 %v795_v58, %v781_v54 }
 0x29e   :  { %v665_v2 = vsel %vm1947_vm7, %v1566_v62, 0.0  ;;  %vm1948_vm12 = vcmp.eq.s32.totalorder %v1387_v36, %v1312_v26  ;;  %v855_v4 = vadd.f32 %v854_v61, %v840_v31  ;;  %vm1949_vm0 = vcmp.eq.s32.totalorder %v1400_v40, %v1297_v22 }
 0x29f   :  { %v724_v3 = vsel %vm1948_vm12, %v1566_v62, 0.0  ;;  %v547_v5 = vsel %vm1949_vm0, %v1603_v12, 0.0  ;;  %vm1950_vm7 = vcmp.eq.s32.totalorder %v1400_v40, %v1302_v23  ;;  %vm593_vm15 = vcmp.eq.s32.totalorder %v1417_v46, %v1302_v23 }
 0x2a0   :  { %v605_v6 = vsel %vm1950_vm7, %v1603_v12, 0.0  ;;  %vm652_vm3 = vcmp.eq.s32.totalorder %v1417_v46, %v1307_v24  ;;  %v562_v8 = vadd.f32 %v561_v51, %v547_v5  ;;  %v664_v10 = vsel %vm648_vm9, %v1603_v12, 0.0 }
 0x2a1   :  { %v620_v9 = vadd.f32 %v619_v56, %v605_v6  ;;  %v723_v11 = vsel %vm707_vm11, %v1603_v12, 0.0  ;;  %vm711_vm12 = vcmp.eq.s32.totalorder %v1417_v46, %v1312_v26  ;;  %v679_v13 = vadd.f32 %v678_v57, %v664_v10 }
 0x2a2   :  { %v738_v14 = vadd.f32 %v737_v60, %v723_v11  ;;  %v782_v15 = vsel %vm766_vm1, %v1603_v12, 0.0  ;;  %vm1951_vm0 = vcmp.eq.s32.totalorder %v1400_v40, %v1322_v28  ;;  %vm770_vm9 = vcmp.eq.s32.totalorder %v1417_v46, %v1317_v27 }
 0x2a3   :  { %v841_v16 = vsel %vm1951_vm0, %v1603_v12, 0.0  ;;  %v563_v35 = vadd.f32 %v562_v8, %v548_v0  ;;  %v621_v17 = vadd.f32 %v620_v9, %v606_v1  ;;  %v797_v19 = vadd.f32 %v796_v32, %v782_v15 }
 0x2a4   :  { %v856_v21 = vadd.f32 %v855_v4, %v841_v16  ;;  %vm829_vm11 = vcmp.eq.s32.totalorder %v1417_v46, %v1322_v28  ;;  %v783_v30 = vsel %vm767_vm13, %v1566_v62, 0.0  ;;  %vm1952_vm1 = vcmp.eq.s32.totalorder %v1387_v36, %v1322_v28 }
 0x2a5   :  { %v842_v40 = vsel %vm1952_vm1, %v1566_v62, 0.0  ;;  %v680_v12 = vadd.f32 %v679_v13, %v665_v2  ;;  %v739_v33 = vadd.f32 %v738_v14, %v724_v3  ;;  %vm537_vm7 = vcmp.eq.s32.totalorder %v1700_v38, %v1297_v22 }
 0x2a6   :  { %v549_v37 = vsel %vm533_vm10, %v1591_v7, 0.0  ;;  %vm1953_vm0 = vcmp.eq.s32.totalorder %v1397_v39, %v1302_v23  ;;  %v798_v43 = vadd.f32 %v797_v19, %v783_v30  ;;  %v857_v29 = vadd.f32 %v856_v21, %v842_v40 }
 0x2a7   :  { %v607_v42 = vsel %vm1953_vm0, %v1591_v7, 0.0  ;;  %vm595_vm13 = vcmp.eq.s32.totalorder %v1700_v38, %v1302_v23  ;;  %v666_v36 = vsel %vm650_vm4, %v1591_v7, 0.0  ;;  %v725_v62 = vsel %vm709_vm6, %v1591_v7, 0.0 }
 0x2a8   :  { %vm1954_vm10 = vcmp.eq.s32.totalorder %v1397_v39, %v1317_v27  ;;  %vm1955_vm1 = vcmp.eq.s32.totalorder %v1397_v39, %v1322_v28  ;;  %vm654_vm0 = vcmp.eq.s32.totalorder %v1700_v38, %v1307_v24  ;;  %v552_v48 = vsel %vm536_vm5, %v1662_v50, 0.0 }
 0x2a9   :  { %v784_v44 = vsel %vm1954_vm10, %v1591_v7, 0.0  ;;  %v843_v47 = vsel %vm1955_vm1, %v1591_v7, 0.0  ;;  %vm1956_vm4 = vcmp.eq.s32.totalorder %v1403_v41, %v1302_v23  ;;  %vm1957_vm6 = vcmp.eq.s32.totalorder %v1403_v41, %v1307_v24 }
 0x2aa   :  { %v610_v49 = vsel %vm1956_vm4, %v1662_v50, 0.0  ;;  %v669_v34 = vsel %vm1957_vm6, %v1662_v50, 0.0  ;;  %vm1958_vm10 = vcmp.eq.s32.totalorder %v1403_v41, %v1312_v26  ;;  %vm713_vm1 = vcmp.eq.s32.totalorder %v1700_v38, %v1312_v26 }
 0x2ab   :  { %v728_v39 = vsel %vm1958_vm10, %v1662_v50, 0.0  ;;  %vm1959_vm5 = vcmp.eq.s32.totalorder %v1403_v41, %v1317_v27  ;;  %v846_v18 = vsel %vm830_vm2, %v1662_v50, 0.0  ;;  %v550_v51 = vsel %vm534_vm14, %v1678_v55, 0.0 }
 0x2ac   :  { %v787_v7 = vsel %vm1959_vm5, %v1662_v50, 0.0  ;;  %v608_v52 = vsel %vm592_vm8, %v1678_v55, 0.0  ;;  %vm772_vm4 = vcmp.eq.s32.totalorder %v1700_v38, %v1317_v27  ;;  %vm1960_vm6 = vcmp.eq.s32.totalorder %v1414_v45, %v1307_v24 }
 0x2ad   :  { %v667_v53 = vsel %vm1960_vm6, %v1678_v55, 0.0  ;;  %vm1961_vm2 = vcmp.eq.s32.totalorder %v1414_v45, %v1312_v26  ;;  %vm1962_vm14 = vcmp.eq.s32.totalorder %v1414_v45, %v1317_v27  ;;  %vm831_vm8 = vcmp.eq.s32.totalorder %v1700_v38, %v1322_v28 }
 0x2ae   :  { %v726_v41 = vsel %vm1961_vm2, %v1678_v55, 0.0  ;;  %v785_v50 = vsel %vm1962_vm14, %v1678_v55, 0.0  ;;  %v564_v54 = vadd.f32 %v563_v35, %v549_v37  ;;  %vm1963_vm10 = vcmp.eq.s32.totalorder %v1414_v45, %v1322_v28 }
 0x2af   :  { %v844_v56 = vsel %vm1963_vm10, %v1678_v55, 0.0  ;;  %vm1964_vm5 = vcmp.eq.s32.totalorder %v1417_v46, %v1297_v22  ;;  %v622_v58 = vadd.f32 %v621_v17, %v607_v42  ;;  %v681_v31 = vadd.f32 %v680_v12, %v666_v36 }
 0x2b0   :  { %v551_v57 = vsel %vm1964_vm5, %v1702_v63, 0.0  ;;  %v565_v60 = vadd.f32 %v564_v54, %v550_v51  ;;  %v609_v61 = vsel %vm593_vm15, %v1702_v63, 0.0  ;;  %v668_v0 = vsel %vm652_vm3, %v1702_v63, 0.0 }
 0x2b1   :  { %v740_v45 = vadd.f32 %v739_v33, %v725_v62  ;;  %v623_v55 = vadd.f32 %v622_v58, %v608_v52  ;;  %v682_v1 = vadd.f32 %v681_v31, %v667_v53  ;;  %v727_v2 = vsel %vm711_vm12, %v1702_v63, 0.0 }
 0x2b2   :  { %v799_v32 = vadd.f32 %v798_v43, %v784_v44  ;;  %v566_v3 = vadd.f32 %v565_v60, %v551_v57  ;;  %v786_v5 = vsel %vm770_vm9, %v1702_v63, 0.0  ;;  %v858_v6 = vadd.f32 %v857_v29, %v843_v47 }
 0x2b3   :  { %v741_v4 = vadd.f32 %v740_v45, %v726_v41  ;;  %v624_v8 = vadd.f32 %v623_v55, %v609_v61  ;;  %v683_v9 = vadd.f32 %v682_v1, %v668_v0  ;;  %v845_v11 = vsel %vm829_vm11, %v1702_v63, 0.0 }
 0x2b4   :  { %v800_v10 = vadd.f32 %v799_v32, %v785_v50  ;;  %v553_v13 = vsel %vm537_vm7, %v1691_v59, 0.0  ;;  %v567_v14 = vadd.f32 %v566_v3, %v552_v48  ;;  %v859_v16 = vadd.f32 %v858_v6, %v844_v56 }
 0x2b5   :  { %v742_v15 = vadd.f32 %v741_v4, %v727_v2  ;;  %v611_v35 = vsel %vm595_vm13, %v1691_v59, 0.0  ;;  %v625_v17 = vadd.f32 %v624_v8, %v610_v49  ;;  %v684_v19 = vadd.f32 %v683_v9, %v669_v34 }
 0x2b6   :  { %v801_v21 = vadd.f32 %v800_v10, %v786_v5  ;;  %v670_v46 = vsel %vm654_vm0, %v1691_v59, 0.0  ;;  %v568_v63 = vadd.f32 %v567_v14, %v553_v13  ;;  %v860_v22 = vadd.f32 %v859_v16, %v845_v11 }
 0x2b7   :  { %v743_v30 = vadd.f32 %v742_v15, %v728_v39  ;;  %v729_v40 = vsel %vm713_vm1, %v1691_v59, 0.0  ;;  %v626_v12 = vadd.f32 %v625_v17, %v611_v35  ;;  %v685_v33 = vadd.f32 %v684_v19, %v670_v46 }
 0x2b8   :  { %v802_v23 = vadd.f32 %v801_v21, %v787_v7  ;;  %v788_v37 = vsel %vm772_vm4, %v1691_v59, 0.0  ;;  %v569_v42 = vrot.slane %v568_v63, 4  ;;  %v861_v24 = vadd.f32 %v860_v22, %v846_v18 }
 0x2b9   :  { %v744_v43 = vadd.f32 %v743_v30, %v729_v40  ;;  %v847_v29 = vsel %vm831_vm8, %v1691_v59, 0.0  ;;  %v627_v36 = vrot.slane %v626_v12, 4  ;;  %v686_v62 = vrot.slane %v685_v33, 4 }
 0x2ba   :  { %v803_v26 = vadd.f32 %v802_v23, %v788_v37  ;;  %v570_v44 = vadd.f32 %v569_v42, %v568_v63  ;;  %v862_v48 = vadd.f32 %v861_v24, %v847_v29  ;;  %vm870_vm3 = vcmask 1040384  }
 0x2bb   :  { %v745_v47 = vrot.slane %v744_v43, 4  ;;  %v628_v49 = vadd.f32 %v627_v36, %v626_v12  ;;  %v687_v34 = vadd.f32 %v686_v62, %v685_v33  ;;  %vm872_vm15 = vcmask 1041408  }
 0x2bc   :  { %v804_v39 = vrot.slane %v803_v26, 4  ;;  %v571_v7 = vrot.slane %v570_v44, 2  ;;  %v863_v51 = vrot.slane %v862_v48, 4  ;;  %vm874_vm12 = vcmask 1042432  }
 0x2bd   :  { %v746_v27 = vadd.f32 %v745_v47, %v744_v43  ;;  %v629_v52 = vrot.slane %v628_v49, 2  ;;  %v688_v53 = vrot.slane %v687_v34, 2  ;;  %vm876_vm9 = vcmask 1043456  }
 0x2be   :  { %v805_v18 = vadd.f32 %v804_v39, %v803_v26  ;;  %v572_v41 = vadd.f32 %v571_v7, %v570_v44  ;;  %v864_v54 = vadd.f32 %v863_v51, %v862_v48  ;;  %vm878_vm11 = vcmask 1044480  }
 0x2bf   :  { %v747_v50 = vrot.slane %v746_v27, 2  ;;  %v630_v28 = vadd.f32 %v629_v52, %v628_v49  ;;  %v689_v59 = vadd.f32 %v688_v53, %v687_v34  ;;  %v1133_v30 = vmov 1966171168  }
 0x2c0   :  { %v806_v38 = vrot.slane %v805_v18, 2  ;;  %v865_v57 = vrot.slane %v864_v54, 2  ;;  %v573_v58 = vrot.slane %v572_v41, 1  ;;  %v888_v22 = vunpack.c.l.s4 %v1133_v30 }
 0x2c1   :  { %v748_v56 = vadd.f32 %v747_v50, %v746_v27  ;;  %v631_v31 = vrot.slane %v630_v28, 1  ;;  %v690_v60 = vrot.slane %v689_v59, 1  ;;  %vm912_vm7 = vcmp.lt.s32.totalorder %v39_v25, 128 }
 0x2c2   :  { %v807_v61 = vadd.f32 %v806_v38, %v805_v18  ;;  %v866_v45 = vadd.f32 %v865_v57, %v864_v54  ;;  %v574_v4 = vadd.f32 %v573_v58, %v572_v41  ;;  %v889_v40 = vunpack.c.0.s8 %v888_v22 }
 0x2c3   :  { %v749_v0 = vrot.slane %v748_v56, 1  ;;  %v632_v55 = vadd.f32 %v631_v31, %v630_v28  ;;  %v691_v1 = vadd.f32 %v690_v60, %v689_v59 }
 0x2c4   :  { %v808_v2 = vrot.slane %v807_v61, 1  ;;  %v867_v3 = vrot.slane %v866_v45, 1  ;;  %v892_v12 = vsub.s32 %v889_v40, %v1291_v20 }
 0x2c5   :  { %v750_v32 = vadd.f32 %v749_v0, %v748_v56  ;;  %v633_v5 = vsub.f32 0.0, %v632_v55  ;;  %v692_v6 = vsub.f32 0.0, %v691_v1 }
 0x2c6   :  { %v809_v8 = vadd.f32 %v808_v2, %v807_v61  ;;  %v868_v9 = vadd.f32 %v867_v3, %v866_v45 }
 0x2c7   :  { %v751_v10 = vsub.f32 0.0, %v750_v32  ;;  %v871_v11 = vsel %vm870_vm3, %v574_v4, %v633_v5 }
 0x2c8   :  { %v810_v13 = vsub.f32 0.0, %v809_v8  ;;  %v873_v14 = vsel %vm872_vm15, %v871_v11, %v692_v6  ;;  %v869_v15 = vsub.f32 0.0, %v868_v9 }
 0x2c9   :  { %v875_v16 = vsel %vm874_vm12, %v873_v14, %v751_v10 }
 0x2ca   :  { %v877_v35 = vsel %vm876_vm9, %v875_v16, %v810_v13 }
 0x2cb   :  { %v879_v17 = vsel %vm878_vm11, %v877_v35, %v869_v15 }
 0x2cc   :  { %v880_v19 = vsub.f32 0.0, %v879_v17 }
 0x2ce   :  { %v881_v21 = vmul.f32 1.442695, %v880_v19 }
 0x2d0   :  { %1127 = vpow2.f32 %v881_v21 }
 0x2da   :  { %v1128_v46 = vpop.eup %1127 }
 0x2db   :  { %v883_v63 = vadd.f32 1.0, %v1128_v46 }
 0x2dd   :  { %1129 = vrcp.f32 %v883_v63 }
 0x2e7   :  { %v1130_v33 = vpop.eup %1129 }
 0x2e8   :  { %885 = vst [vmem:[%s1923_s5] sm:$0x1] %v1130_v33  ;;  %v893_v23 = vrot.slane %v1130_v33, %v892_v12  ;;  %v921_v37 = vcombine.high %v1130_v33, %v1130_v33 }
 0x2ea   :  { %v894_v42 = vcombine.high %v893_v23, %v893_v23  ;;  %v901_v43 = vrot.slane %v893_v23, %v892_v12  ;;  %v928_v24 = vrot.slane %v921_v37, %v892_v12 }
 0x2ec   :  { %v908_v29 = vrot.slane %v894_v42, %v892_v12  ;;  %v915_v36 = vcombine.high %v901_v43, %v901_v43  ;;  %v935_v62 = vrot.slane %v928_v24, %v892_v12  ;;  %v938_v26 = vcombine.high %v928_v24, %v928_v24 }
 0x2ee   :  { %914 = vst.msk [vmem:[%s1924_s6] sm:$0x1] %vm912_vm7, %v908_v29  ;;  %917 = vst.msk [vmem:[%s1924_s6 + $0x1] sm:$0x1] %vm912_vm7, %v915_v36  ;;  %v918_v20 = vcombine.high %v908_v29, %v908_v29  ;;  %v945_v44 = vrot.slane %v938_v26, %v892_v12 }
 0x2ef   :  { %937 = vst.msk [vmem:[%s1924_s6 + $0x3] sm:$0x1] %vm912_vm7, %v935_v62 }
 0x2f0   :  { %920 = vst.msk [vmem:[%s1924_s6 + $0x2] sm:$0x1] %vm912_vm7, %v918_v20  ;;  %947 = vst.msk [vmem:[%s1924_s6 + $0x4] sm:$0x1] %vm912_vm7, %v945_v44 }

</bundles_post_ra>
